<compile_context>
chip_gen: v6e
topology: v6e:2x2x1
jax: 0.10.0
libtpu: 0.0.40
codegen_flags: <defaults>
</compile_context>

<pallas_src>
import functools

import jax
import jax.numpy as jnp
from jax.experimental import pallas as pl
from jax.experimental.pallas import tpu as pltpu


def _round_up(x, m):
    return (x + m - 1) // m * m


def _qnetwork_kernel(x_ref, w1_ref, b1_ref, w2_ref, b2_ref, w3_ref, b3_ref, o_ref):
    """Fused MLP forward for one (TB, S_pad) batch tile.

    Matmuls hit the MXU in bf16 with f32 accumulation; bias add + ReLU are f32
    VPU elementwise ops. Weights/biases are grid-invariant (constant index_map)
    so they are loaded once and stay resident in VMEM across batch tiles.
    """
    x = x_ref[...].astype(jnp.bfloat16)                                   # (TB, S)

    # layer 1: relu(x @ W1 + b1)
    h1 = jnp.dot(x, w1_ref[...], preferred_element_type=jnp.float32)
    h1 = jnp.maximum(h1 + b1_ref[...], 0.0)                               # (TB, H)

    # layer 2: relu(h1 @ W2 + b2)
    h2 = jnp.dot(h1.astype(jnp.bfloat16), w2_ref[...],
                 preferred_element_type=jnp.float32)
    h2 = jnp.maximum(h2 + b2_ref[...], 0.0)                               # (TB, H)

    # layer 3: h2 @ W3 + b3 (no activation), lane-dense (TB, 128) store
    out = jnp.dot(h2.astype(jnp.bfloat16), w3_ref[...],
                  preferred_element_type=jnp.float32)
    o_ref[...] = (out + b3_ref[...]).astype(o_ref.dtype)                  # (TB, A_pad)


@functools.partial(jax.jit, static_argnames=("block_batch",))
def qnetwork_forward(state, w1, b1, w2, b2, w3, b3, *, block_batch=256):
    """state: (B, S) f32.  w_i stored (in, out), b_i stored (1, out), all f32."""
    batch, state_size = state.shape
    hidden1 = w1.shape[1]
    hidden2 = w2.shape[1]
    action_size = w3.shape[1]

    LANE = 128
    SUBLANE = 8

    # ---- pad feature dims to lane width, batch to a multiple of the tile ----
    s_p = _round_up(state_size, LANE)
    h1_p = _round_up(hidden1, LANE)
    h2_p = _round_up(hidden2, LANE)
    a_p = _round_up(action_size, LANE)

    tb = min(block_batch, _round_up(batch, SUBLANE))   # batch tile (multiple of 8)
    b_p = _round_up(batch, tb)

    f32, bf16 = jnp.float32, jnp.bfloat16
    x_p = jnp.zeros((b_p, s_p), f32).at[:batch, :state_size].set(state)
    w1_p = jnp.zeros((s_p, h1_p), bf16).at[:state_size, :hidden1].set(w1.astype(bf16))
    w2_p = jnp.zeros((h1_p, h2_p), bf16).at[:hidden1, :hidden2].set(w2.astype(bf16))
    w3_p = jnp.zeros((h2_p, a_p), bf16).at[:hidden2, :action_size].set(w3.astype(bf16))
    b1_p = jnp.zeros((1, h1_p), f32).at[:, :hidden1].set(b1)
    b2_p = jnp.zeros((1, h2_p), f32).at[:, :hidden2].set(b2)
    b3_p = jnp.zeros((1, a_p), f32).at[:, :action_size].set(b3)

    grid = (b_p // tb,)

    batch_spec = lambda shape: pl.BlockSpec(shape, lambda i: (0, 0) * 0 + (i, 0))
    const_spec = lambda shape: pl.BlockSpec(shape, lambda i: (0, 0))

    flops = 2 * b_p * (s_p * h1_p + h1_p * h2_p + h2_p * a_p)
    bytes_accessed = (
        b_p * (s_p + a_p) * 4                                   # x in, out
        + (s_p * h1_p + h1_p * h2_p + h2_p * a_p) * 2           # bf16 weights
        + (h1_p + h2_p + a_p) * 4                               # f32 biases
    )

    out_padded = pl.pallas_call(
        _qnetwork_kernel,
        out_shape=jax.ShapeDtypeStruct((b_p, a_p), f32),
        grid=grid,
        in_specs=[
            batch_spec((tb, s_p)),
            const_spec((s_p, h1_p)), const_spec((1, h1_p)),
            const_spec((h1_p, h2_p)), const_spec((1, h2_p)),
            const_spec((h2_p, a_p)), const_spec((1, a_p)),
        ],
        out_specs=batch_spec((tb, a_p)),
        compiler_params=pltpu.CompilerParams(
            dimension_semantics=("parallel",),
        ),
        cost_estimate=pl.CostEstimate(
            flops=flops, transcendentals=0, bytes_accessed=bytes_accessed),
    )(x_p, w1_p, b1_p, w2_p, b2_p, w3_p, b3_p)

    return out_padded[:batch, :action_size]


def init_qnetwork_params(key, state_size, action_size, hidden_size=64):
    """Deterministic init matching nn.Linear's default U(-1/sqrt(fan_in), 1/sqrt(fan_in))."""
    keys = jax.random.split(key, 6)

    def linear(kw, kb, fan_in, fan_out):
        bound = 1.0 / jnp.sqrt(jnp.float32(fan_in))
        # stored as (in, out) so the kernel does x @ W directly
        w = jax.random.uniform(kw, (fan_in, fan_out), jnp.float32, -bound, bound)
        b = jax.random.uniform(kb, (1, fan_out), jnp.float32, -bound, bound)
        return w, b

    w1, b1 = linear(keys[0], keys[1], state_size, hidden_size)
    w2, b2 = linear(keys[2], keys[3], hidden_size, hidden_size)
    w3, b3 = linear(keys[4], keys[5], hidden_size, action_size)
    return w1, b1, w2, b2, w3, b3


if __name__ == "__main__":
    key = jax.random.PRNGKey(0)
    k_params, k_state = jax.random.split(key)

    batch = 2
    state_size = 8
    action_size = 4
    hidden_size = 32

    params = init_qnetwork_params(k_params, state_size, action_size, hidden_size)
    state = jax.random.normal(k_state, (batch, state_size), jnp.float32)

    out = qnetwork_forward(state, *params)
    jax.block_until_ready(out)
    assert out.shape == (batch, action_size)

    w1, b1, w2, b2, w3, b3 = params

    # Reference using the same bf16-input / f32-accumulate math as the kernel.
    bf16, f32 = jnp.bfloat16, jnp.float32
    ref = jnp.maximum(
        jnp.dot(state.astype(bf16), w1.astype(bf16), preferred_element_type=f32) + b1, 0.0)
    ref = jnp.maximum(
        jnp.dot(ref.astype(bf16), w2.astype(bf16), preferred_element_type=f32) + b2, 0.0)
    ref = jnp.dot(ref.astype(bf16), w3.astype(bf16), preferred_element_type=f32) + b3
    assert jnp.allclose(out, ref, atol=1e-3, rtol=1e-3), (out, ref)

    # Sanity check against the full-f32 PyTorch-equivalent forward (looser tol
    # because the kernel uses bf16 MXU inputs).
    ref32 = jnp.maximum(state @ w1 + b1, 0.0)
    ref32 = jnp.maximum(ref32 @ w2 + b2, 0.0)
    ref32 = ref32 @ w3 + b3
    assert jnp.allclose(out, ref32, atol=5e-2, rtol=5e-2), (out, ref32)

    print("KERNEL_OK")
</pallas_src>

<mosaic_0001>
module attributes {stable_mosaic.version = 11 : i64} {
  func.func @_qnetwork_kernel(%arg0: i32, %arg1: memref<8x128xf32, #tpu.memory_space<vmem>>, %arg2: memref<128x128xbf16, #tpu.memory_space<vmem>>, %arg3: memref<1x128xf32, #tpu.memory_space<vmem>>, %arg4: memref<128x128xbf16, #tpu.memory_space<vmem>>, %arg5: memref<1x128xf32, #tpu.memory_space<vmem>>, %arg6: memref<128x128xbf16, #tpu.memory_space<vmem>>, %arg7: memref<1x128xf32, #tpu.memory_space<vmem>>, %arg8: memref<8x128xf32, #tpu.memory_space<vmem>>) attributes {dimension_semantics = [#tpu.dimension_semantics<parallel>], iteration_bounds = array<i64: 1>, scalar_prefetch = 0 : i64, scratch_operands = 0 : i64, tpu.core_type = #tpu.core_type<tc>, window_params = [{transform_indices = @transform_0, window_bounds = array<i64: 8, 128>}, {pipeline_mode = #tpu.pipeline_mode<synchronous>, transform_indices = @transform_1, window_bounds = array<i64: 128, 128>}, {pipeline_mode = #tpu.pipeline_mode<synchronous>, transform_indices = @transform_2, window_bounds = array<i64: 1, 128>}, {pipeline_mode = #tpu.pipeline_mode<synchronous>, transform_indices = @transform_3, window_bounds = array<i64: 128, 128>}, {pipeline_mode = #tpu.pipeline_mode<synchronous>, transform_indices = @transform_4, window_bounds = array<i64: 1, 128>}, {pipeline_mode = #tpu.pipeline_mode<synchronous>, transform_indices = @transform_5, window_bounds = array<i64: 128, 128>}, {pipeline_mode = #tpu.pipeline_mode<synchronous>, transform_indices = @transform_6, window_bounds = array<i64: 1, 128>}, {transform_indices = @transform_7, window_bounds = array<i64: 8, 128>}]} {
    %c0 = arith.constant 0 : index
    %c0_0 = arith.constant 0 : index
    %0 = vector.load %arg1[%c0, %c0_0] : memref<8x128xf32, #tpu.memory_space<vmem>>, vector<8x128xf32>
    %1 = arith.truncf %0 : vector<8x128xf32> to vector<8x128xbf16>
    %c0_1 = arith.constant 0 : index
    %c0_2 = arith.constant 0 : index
    %2 = vector.load %arg2[%c0_1, %c0_2] : memref<128x128xbf16, #tpu.memory_space<vmem>>, vector<128x128xbf16>
    %cst = arith.constant dense<0.000000e+00> : vector<8x128xf32>
    %3 = tpu.matmul %1, %2, %cst {dimension_numbers = #tpu.dot_dimension_numbers<[1], [0], [0], [1], [0, 0, 1, 1], [], []>} : vector<8x128xbf16>, vector<128x128xbf16>, vector<8x128xf32> -> vector<8x128xf32>
    %c0_3 = arith.constant 0 : index
    %c0_4 = arith.constant 0 : index
    %4 = vector.load %arg3[%c0_3, %c0_4] : memref<1x128xf32, #tpu.memory_space<vmem>>, vector<1x128xf32>
    %5 = vector.broadcast %4 : vector<1x128xf32> to vector<8x128xf32>
    %6 = arith.addf %3, %5 : vector<8x128xf32>
    %cst_5 = arith.constant 0.000000e+00 : f32
    %7 = vector.broadcast %cst_5 : f32 to vector<8x128xf32>
    %8 = arith.maximumf %6, %7 : vector<8x128xf32>
    %9 = arith.truncf %8 : vector<8x128xf32> to vector<8x128xbf16>
    %c0_6 = arith.constant 0 : index
    %c0_7 = arith.constant 0 : index
    %10 = vector.load %arg4[%c0_6, %c0_7] : memref<128x128xbf16, #tpu.memory_space<vmem>>, vector<128x128xbf16>
    %cst_8 = arith.constant dense<0.000000e+00> : vector<8x128xf32>
    %11 = tpu.matmul %9, %10, %cst_8 {dimension_numbers = #tpu.dot_dimension_numbers<[1], [0], [0], [1], [0, 0, 1, 1], [], []>} : vector<8x128xbf16>, vector<128x128xbf16>, vector<8x128xf32> -> vector<8x128xf32>
    %c0_9 = arith.constant 0 : index
    %c0_10 = arith.constant 0 : index
    %12 = vector.load %arg5[%c0_9, %c0_10] : memref<1x128xf32, #tpu.memory_space<vmem>>, vector<1x128xf32>
    %13 = vector.broadcast %12 : vector<1x128xf32> to vector<8x128xf32>
    %14 = arith.addf %11, %13 : vector<8x128xf32>
    %cst_11 = arith.constant 0.000000e+00 : f32
    %15 = vector.broadcast %cst_11 : f32 to vector<8x128xf32>
    %16 = arith.maximumf %14, %15 : vector<8x128xf32>
    %17 = arith.truncf %16 : vector<8x128xf32> to vector<8x128xbf16>
    %c0_12 = arith.constant 0 : index
    %c0_13 = arith.constant 0 : index
    %18 = vector.load %arg6[%c0_12, %c0_13] : memref<128x128xbf16, #tpu.memory_space<vmem>>, vector<128x128xbf16>
    %cst_14 = arith.constant dense<0.000000e+00> : vector<8x128xf32>
    %19 = tpu.matmul %17, %18, %cst_14 {dimension_numbers = #tpu.dot_dimension_numbers<[1], [0], [0], [1], [0, 0, 1, 1], [], []>} : vector<8x128xbf16>, vector<128x128xbf16>, vector<8x128xf32> -> vector<8x128xf32>
    %c0_15 = arith.constant 0 : index
    %c0_16 = arith.constant 0 : index
    %20 = vector.load %arg7[%c0_15, %c0_16] : memref<1x128xf32, #tpu.memory_space<vmem>>, vector<1x128xf32>
    %21 = vector.broadcast %20 : vector<1x128xf32> to vector<8x128xf32>
    %22 = arith.addf %19, %21 : vector<8x128xf32>
    %c0_17 = arith.constant 0 : index
    %c0_18 = arith.constant 0 : index
    %23 = vector.load %arg8[%c0_17, %c0_18] : memref<8x128xf32, #tpu.memory_space<vmem>>, vector<8x128xf32>
    tpu.vector_store %arg8[%c0_17, %c0_18], %22 {strides = array<i32>} : memref<8x128xf32, #tpu.memory_space<vmem>>, vector<8x128xf32>,
    return
  }
  func.func @transform_0(%arg0: i32) -> (i32, i32) {
    %c0_i32 = arith.constant 0 : i32
    %c0_i32_0 = arith.constant 0 : i32
    return %arg0, %c0_i32 : i32, i32
  }
  func.func @transform_1(%arg0: i32) -> (i32, i32) {
    %c0_i32 = arith.constant 0 : i32
    %c0_i32_0 = arith.constant 0 : i32
    %c0_i32_1 = arith.constant 0 : i32
    return %c0_i32, %c0_i32_0 : i32, i32
  }
  func.func @transform_2(%arg0: i32) -> (i32, i32) {
    %c0_i32 = arith.constant 0 : i32
    %c0_i32_0 = arith.constant 0 : i32
    %c0_i32_1 = arith.constant 0 : i32
    return %c0_i32, %c0_i32_0 : i32, i32
  }
  func.func @transform_3(%arg0: i32) -> (i32, i32) {
    %c0_i32 = arith.constant 0 : i32
    %c0_i32_0 = arith.constant 0 : i32
    %c0_i32_1 = arith.constant 0 : i32
    return %c0_i32, %c0_i32_0 : i32, i32
  }
  func.func @transform_4(%arg0: i32) -> (i32, i32) {
    %c0_i32 = arith.constant 0 : i32
    %c0_i32_0 = arith.constant 0 : i32
    %c0_i32_1 = arith.constant 0 : i32
    return %c0_i32, %c0_i32_0 : i32, i32
  }
  func.func @transform_5(%arg0: i32) -> (i32, i32) {
    %c0_i32 = arith.constant 0 : i32
    %c0_i32_0 = arith.constant 0 : i32
    %c0_i32_1 = arith.constant 0 : i32
    return %c0_i32, %c0_i32_0 : i32, i32
  }
  func.func @transform_6(%arg0: i32) -> (i32, i32) {
    %c0_i32 = arith.constant 0 : i32
    %c0_i32_0 = arith.constant 0 : i32
    %c0_i32_1 = arith.constant 0 : i32
    return %c0_i32, %c0_i32_0 : i32, i32
  }
  func.func @transform_7(%arg0: i32) -> (i32, i32) {
    %c0_i32 = arith.constant 0 : i32
    %c0_i32_0 = arith.constant 0 : i32
    return %arg0, %c0_i32 : i32, i32
  }
}

</mosaic_0001>

<bundles_post_ra>
// kernel: qnetwork_forward.1
= control target key start
LH: loop header
LB: loop body
LE: loop exit
PB: predicated region body
PF: predicated region fallthrough
CT: control target
= control target key end

     0   :  { %v511_v0 = vmov 0.0   ;;  %vm512_vm0 = vmmov 0   ;;  %s670_s1 = inlined_call_operand.vmem [shape: bf16[128,128], index: 1, kind: input, shape index: {}]   ;;  %s671_s3 = inlined_call_operand.vmem [shape: bf16[128,128], index: 3, kind: input, shape index: {}]   ;;  %s672_s0 = inlined_call_operand.vmem [shape: f32[8,128], index: 0, kind: input, shape index: {}]   ;;  %s673_s5 = inlined_call_operand.vmem [shape: bf16[128,128], index: 5, kind: input, shape index: {}]   ;;  %s674_s2 = inlined_call_operand.vmem [shape: f32[1,128], index: 2, kind: input, shape index: {}]   ;;  %s675_s4 = inlined_call_operand.vmem [shape: f32[1,128], index: 4, kind: input, shape index: {}]   ;;  %s676_s6 = inlined_call_operand.vmem [shape: f32[1,128], index: 6, kind: input, shape index: {}]   ;;  %s677_s7 = inlined_call_operand.vmem [shape: f32[8,128], index: 7, kind: output, shape index: {}]  }
   0x1   :  { %425 = vmatprep.subr.bf16.mxu0 %v511_v0  ;;  %v487_v1 = vld [vmem:[%s670_s1 + $0x38] sm:$0xff]   ;;  %441 = vmatprep.mubr.msk.bf16.mxu0 %vm512_vm0, %v511_v0  ;;  %v488_v2 = vld [vmem:[%s670_s1 + $0x30] sm:$0xff]   ;;  %v489_v3 = vld [vmem:[%s670_s1 + $0x28] sm:$0xff]  }
   0x2   :  { %445 = vmatprep.subr.bf16.mxu1 %v511_v0  ;;  %461 = vmatprep.mubr.msk.bf16.mxu1 %vm512_vm0, %v511_v0  ;;  %v495_v4 = vld [vmem:[%s671_s3 + $0x38] sm:$0xff]   ;;  %v490_v5 = vld [vmem:[%s670_s1 + $0x20] sm:$0xff]   ;;  %v496_v6 = vld [vmem:[%s671_s3 + $0x30] sm:$0xff]  }
   0x3   :  { %426 = vmatpush3.bf16.msra.mxu0 %v487_v1  ;;  %446 = vmatpush3.bf16.msra.mxu1 %v495_v4  ;;  %v491_v7 = vld [vmem:[%s670_s1 + $0x18] sm:$0xff]   ;;  %v497_v8 = vld [vmem:[%s671_s3 + $0x28] sm:$0xff]   ;;  %v492_v9 = vld [vmem:[%s670_s1 + $0x10] sm:$0xff]  }
   0x4   :  { %427 = vmatprep.subr.bf16.mxu0 %v511_v0  ;;  %447 = vmatprep.subr.bf16.mxu1 %v511_v0  ;;  %v498_v10 = vld [vmem:[%s671_s3 + $0x20] sm:$0xff]   ;;  %v493_v11 = vld [vmem:[%s670_s1 + $0x8] sm:$0xff]   ;;  %v499_v12 = vld [vmem:[%s671_s3 + $0x18] sm:$0xff]  }
   0x5   :  { %v494_v13 = vld [vmem:[%s670_s1] sm:$0xff]   ;;  %v500_v15 = vld [vmem:[%s671_s3 + $0x10] sm:$0xff]   ;;  %v501_v17 = vld [vmem:[%s671_s3 + $0x8] sm:$0xff]  }
   0x6   :  { %v27_v14 = vld [vmem:[%s672_s0] sm:$0xff]  ;;  %v503_v19 = vld [vmem:[%s673_s5 + $0x38] sm:$0xff]   ;;  %v504_v20 = vld [vmem:[%s673_s5 + $0x30] sm:$0xff]  }
   0x7   :  { %428 = vmatpush3.bf16.msra.mxu0 %v488_v2  ;;  %448 = vmatpush3.bf16.msra.mxu1 %v496_v6  ;;  %v28_v16 = vpack.c.bf16 %v27_v14, %v27_v14  ;;  %v502_v18 = vld [vmem:[%s671_s3] sm:$0xff]   ;;  %v505_v21 = vld [vmem:[%s673_s5 + $0x28] sm:$0xff]   ;;  %v507_v23 = vld [vmem:[%s673_s5 + $0x18] sm:$0xff]  }
   0x8   :  { %429 = vmatprep.subr.bf16.mxu0 %v511_v0  ;;  %449 = vmatprep.subr.bf16.mxu1 %v511_v0  ;;  %v506_v22 = vld [vmem:[%s673_s5 + $0x20] sm:$0xff]   ;;  %v508_v24 = vld [vmem:[%s673_s5 + $0x10] sm:$0xff]   ;;  %v509_v33 = vld [vmem:[%s673_s5 + $0x8] sm:$0xff]  }
   0x9   :  { %v371_v25 = vld [vmem:[%s674_s2] ss:$0 sm:$0xff] }
   0xa   :  { %v510_v34 = vld [vmem:[%s673_s5] sm:$0xff]  }
   0xb   :  { %430 = vmatpush3.bf16.msra.mxu0 %v489_v3  ;;  %450 = vmatpush3.bf16.msra.mxu1 %v497_v8  ;;  %v380_v35 = vld [vmem:[%s675_s4] ss:$0 sm:$0xff] }
   0xc   :  { %431 = vmatprep.subr.bf16.mxu0 %v511_v0  ;;  %451 = vmatprep.subr.bf16.mxu1 %v511_v0  ;;  %v389_v43 = vld [vmem:[%s676_s6] ss:$0 sm:$0xff] }
   0xf   :  { %432 = vmatpush3.bf16.msra.mxu0 %v490_v5  ;;  %452 = vmatpush3.bf16.msra.mxu1 %v498_v10 }
  0x10   :  { %433 = vmatprep.subr.bf16.mxu0 %v511_v0  ;;  %453 = vmatprep.subr.bf16.mxu1 %v511_v0 }
  0x13   :  { %434 = vmatpush3.bf16.msra.mxu0 %v491_v7  ;;  %454 = vmatpush3.bf16.msra.mxu1 %v499_v12 }
  0x14   :  { %435 = vmatprep.subr.bf16.mxu0 %v511_v0  ;;  %455 = vmatprep.subr.bf16.mxu1 %v511_v0 }
  0x17   :  { %436 = vmatpush3.bf16.msra.mxu0 %v492_v9  ;;  %456 = vmatpush3.bf16.msra.mxu1 %v500_v15 }
  0x18   :  { %437 = vmatprep.subr.bf16.mxu0 %v511_v0  ;;  %457 = vmatprep.subr.bf16.mxu1 %v511_v0 }
  0x1b   :  { %438 = vmatpush3.bf16.msra.mxu0 %v493_v11  ;;  %458 = vmatpush3.bf16.msra.mxu1 %v501_v17 }
  0x1c   :  { %439 = vmatprep.subr.bf16.mxu0 %v511_v0  ;;  %459 = vmatprep.subr.bf16.mxu1 %v511_v0 }
  0x1f   :  { %440 = vmatpush3.bf16.msra.mxu0 %v494_v13  ;;  %460 = vmatpush3.bf16.msra.mxu1 %v502_v18 }
  0x20   :  { %465 = vmatprep.subr.bf16.mxu0 %v511_v0 }
  0x22   :  { %442 = vmatmul.mubr.bf16.vlgmr.msra.gmra.mxu0 %v28_v16 }
  0x23   :  { %481 = vmatprep.mubr.msk.bf16.mxu0 %vm512_vm0, %v511_v0  ;;  %466 = vmatpush3.bf16.msra.mxu0 %v503_v19 }
  0x24   :  { %467 = vmatprep.subr.bf16.mxu0 %v511_v0 }
  0x27   :  { %468 = vmatpush3.bf16.msra.mxu0 %v504_v20 }
  0x28   :  { %469 = vmatprep.subr.bf16.mxu0 %v511_v0 }
  0x2b   :  { %470 = vmatpush3.bf16.msra.mxu0 %v505_v21 }
  0x2c   :  { %471 = vmatprep.subr.bf16.mxu0 %v511_v0 }
  0x2f   :  { %472 = vmatpush3.bf16.msra.mxu0 %v506_v22 }
  0x30   :  { %473 = vmatprep.subr.bf16.mxu0 %v511_v0 }
  0x33   :  { %474 = vmatpush3.bf16.msra.mxu0 %v507_v23 }
  0x34   :  { %475 = vmatprep.subr.bf16.mxu0 %v511_v0 }
  0x37   :  { %476 = vmatpush3.bf16.msra.mxu0 %v508_v24 }
  0x38   :  { %477 = vmatprep.subr.bf16.mxu0 %v511_v0 }
  0x3b   :  { %478 = vmatpush3.bf16.msra.mxu0 %v509_v33 }
  0x3c   :  { %479 = vmatprep.subr.bf16.mxu0 %v511_v0 }
  0x3f   :  { %480 = vmatpush3.bf16.msra.mxu0 %v510_v34 }
  0xe2   :  { %v134_v26 = vpop.f32.mrf.mxu0 }
  0xe3   :  { %v135_v27 = vadd.f32 %v371_v25, %v134_v26 }
  0xe4   :  { %v443_v28 = vpop.f32.mrf.mxu0 }
  0xe5   :  { %v140_v29 = vmax.f32 %v135_v27, 0.0 }
  0xe6   :  { %v137_v30 = vpop.f32.mrf.mxu0 }
  0xe7   :  { %v141_v31 = vpack.c.bf16 %v140_v29, %v140_v29 }
  0xe8   :  { %v444_v32 = vpop.f32.mrf.mxu0 }
  0xe9   :  { %462 = vmatmul.mubr.bf16.vlgmr.msra.gmra.mxu1 %v141_v31 }
 0x1a9   :  { %v247_v36 = vpop.f32.mrf.mxu1 }
 0x1aa   :  { %v248_v37 = vadd.f32 %v380_v35, %v247_v36 }
 0x1ab   :  { %v463_v38 = vpop.f32.mrf.mxu1 }
 0x1ac   :  { %v253_v39 = vmax.f32 %v248_v37, 0.0 }
 0x1ad   :  { %v250_v40 = vpop.f32.mrf.mxu1 }
 0x1ae   :  { %v254_v41 = vpack.c.bf16 %v253_v39, %v253_v39 }
 0x1af   :  { %v464_v42 = vpop.f32.mrf.mxu1 }
 0x1b0   :  { %482 = vmatmul.mubr.bf16.vlgmr.msra.gmra.mxu0 %v254_v41 }
 0x270   :  { %v360_v44 = vpop.f32.mrf.mxu0 }
 0x271   :  { %v361_v45 = vadd.f32 %v389_v43, %v360_v44 }
 0x272   :  { %v483_v46 = vpop.f32.mrf.mxu0 }
 0x273   :  { %366 = vst [vmem:[%s677_s7] sm:$0xff] %v361_v45 }
 0x274   :  { %v363_v47 = vpop.f32.mrf.mxu0 }
 0x276   :  { %v484_v48 = vpop.f32.mrf.mxu0 }

</bundles_post_ra>
